<compile_context>
chip_gen: v6e
topology: v6e:2x2x1
jax: 0.10.0
libtpu: 0.0.40
codegen_flags: <defaults>
</compile_context>

<pallas_src>
import functools

import jax
import jax.numpy as jnp
from jax.experimental import pallas as pl
from jax.experimental.pallas import tpu as pltpu


_LANE_TILE = 1024        # lanes per block: multiple of 128 -> lane-dense, unmasked stores
_MAX_ROW_TILE = 1024     # max sublane rows per block (1024*1024*4 B = 4 MiB per buffer)
_MIN_GRID_STEPS = 8      # aim for >= ~8 grid steps so both v7x TCs stay busy


def _pact_kernel(params_ref, x_ref, o_ref):
    # params_ref: (3,) f32 in SMEM = [clip, scale, 1/scale] of the selected branch.
    # x_ref / o_ref: (br, _LANE_TILE) VMEM tiles.
    clip = params_ref[0]
    scale = params_ref[1]
    inv_scale = params_ref[2]
    # TODO(synk): for bf16 activations on v6e/v7x the whole chain could stay in bf16;
    # f32 compute here keeps the result bit-comparable with the f32 PyTorch reference.
    x = x_ref[...].astype(jnp.float32)
    q = jnp.floor(jnp.clip(x, 0.0, clip) * scale)        # integer code 0 .. 2^b - 1
    o_ref[...] = (q * inv_scale).astype(o_ref.dtype)     # dequant folded into a multiply


def _pick_row_tile(rows):
    """Row tile <= _MAX_ROW_TILE (multiple of 8) giving >= ~_MIN_GRID_STEPS grid steps."""
    if rows <= 8:
        return rows                                      # block dim == full array dim
    br = max(8, (rows // _MIN_GRID_STEPS) // 8 * 8)
    return min(_MAX_ROW_TILE, br)


@functools.partial(jax.jit, static_argnames=("bits",))
def quant_pact_activ(x, alpha_activ, clip_vals, bits):
    """Forward of QuantPaCTActiv.

    x           : activation tensor of any shape (demo: (N, C, L) for the 1d module)
    alpha_activ : (len(bits),) branch-selection logits (argmax -> one-hot, not learned)
    clip_vals   : (len(bits),) per-branch PACT clip values (module init: 6.0)
    bits        : int or tuple of ints (static)
    """
    bits = (bits,) if isinstance(bits, int) else tuple(bits)
    n_branches = len(bits)
    assert alpha_activ.shape == (n_branches,)
    assert clip_vals.shape == (n_branches,)

    orig_shape = x.shape
    orig_dtype = x.dtype
    total = x.size

    # ---- select the single active branch (one-hot sum == selected branch, exactly) ----
    idx = jnp.argmax(alpha_activ)
    n_levels = jnp.asarray([2.0 ** b - 1.0 for b in bits], jnp.float32)
    clip_f = clip_vals.astype(jnp.float32)
    scales = n_levels / clip_f                           # s_i = (2^b_i - 1) / clip_i
    clip_sel = clip_f[idx]
    scale_sel = scales[idx]
    inv_scale_sel = 1.0 / scale_sel                      # dequant as a multiply (~1 ulp vs divide)
    params = jnp.stack([clip_sel, scale_sel, inv_scale_sel])   # (3,) f32 -> SMEM table

    def pact_jnp(v):                                     # tiny ragged-tail / fallback path
        q = jnp.floor(jnp.clip(v.astype(jnp.float32), 0.0, clip_sel) * scale_sel)
        return (q * inv_scale_sel).astype(orig_dtype)

    flat = x.reshape(-1)                                 # zero-copy
    rows = total // _LANE_TILE
    rem = total - rows * _LANE_TILE                      # < 1024 leftover elements

    if rows == 0:                                        # too small for a lane-dense block
        return pact_jnp(flat).reshape(orig_shape)

    main = flat[: rows * _LANE_TILE].reshape(rows, _LANE_TILE)   # zero-copy when rem == 0
    br = _pick_row_tile(rows)
    grid = (pl.cdiv(rows, br),)                          # partial last block -> masked by Pallas

    out2d = pl.pallas_call(
        _pact_kernel,
        out_shape=jax.ShapeDtypeStruct((rows, _LANE_TILE), orig_dtype),
        grid_spec=pltpu.PrefetchScalarGridSpec(
            num_scalar_prefetch=0,
            grid=grid,
            in_specs=[
                pl.BlockSpec(memory_space=pltpu.MemorySpace.SMEM),    # (3,) scalar table
                pl.BlockSpec((br, _LANE_TILE), lambda r: (r, 0)),
            ],
            out_specs=pl.BlockSpec((br, _LANE_TILE), lambda r: (r, 0)),
        ),
        compiler_params=pltpu.CompilerParams(
            dimension_semantics=("parallel",),    # independent row blocks -> 2-TC shard on v7x
            vmem_limit_bytes=48 * 1024 * 1024),   # 2x(in+out) 4 MiB double-buffers + headroom
    )(params, main)

    out_flat = out2d.reshape(-1)                         # zero-copy
    if rem:
        out_flat = jnp.concatenate([out_flat, pact_jnp(flat[rows * _LANE_TILE:])])
    return out_flat.reshape(orig_shape)


def _reference(x, alpha_activ, clip_vals, bits):
    """Pure-JAX replica of the PyTorch forward math for verification."""
    bits = (bits,) if isinstance(bits, int) else tuple(bits)
    sw = jax.nn.one_hot(jnp.argmax(alpha_activ), len(bits), dtype=jnp.float32)
    out = jnp.zeros(x.shape, jnp.float32)
    for i, b in enumerate(bits):
        clip = clip_vals[i].astype(jnp.float32)
        scale = (2.0 ** b - 1.0) / clip
        q = jnp.floor(jnp.clip(x.astype(jnp.float32), 0.0, clip) * scale) / scale
        out = out + q * sw[i]
    return out.astype(x.dtype)


if __name__ == "__main__":
    key = jax.random.PRNGKey(0)

    # QuantPaCTActiv(bits=[2, 4]) applied to small (N, C, L) activations.
    bits = (2, 4)
    alpha_activ = jnp.full((len(bits),), 0.01, jnp.float32)    # module init -> argmax == 0
    clip_vals = jnp.full((len(bits),), 6.0, jnp.float32)       # per-branch clip_val init

    cases = [
        (2, 4, 1024),   # total % 1024 == 0 -> pure zero-copy kernel path
        (2, 4, 1664),   # rows = 13 -> multi-step grid with a masked partial last block
        (3, 4, 700),    # ragged: kernel on aligned prefix + tiny jnp tail (208 elements)
    ]
    for shape in cases:
        key, sub = jax.random.split(key)
        x = jax.random.normal(sub, shape, jnp.float32) * 3.0   # exercises clamp at 0 and 6
        out = jax.block_until_ready(quant_pact_activ(x, alpha_activ, clip_vals, bits))
        ref = _reference(x, alpha_activ, clip_vals, bits)
        assert out.shape == ref.shape == shape
        assert jnp.allclose(out, ref, atol=1e-6, rtol=1e-6), shape

    print("KERNEL_OK")
</pallas_src>

<mosaic_0001>
module attributes {stable_mosaic.version = 11 : i64} {
  func.func @_pact_kernel(%arg0: i32, %arg1: memref<3xf32, #tpu.memory_space<smem>>, %arg2: memref<8x1024xf32, #tpu.memory_space<vmem>>, %arg3: memref<8x1024xf32, #tpu.memory_space<vmem>>) attributes {dimension_semantics = [#tpu.dimension_semantics<parallel>], iteration_bounds = array<i64: 1>, scalar_prefetch = 0 : i64, scratch_operands = 0 : i64, tpu.core_type = #tpu.core_type<tc>, window_params = [{transform_indices = @transform_0, window_bounds = array<i64: 3>}, {transform_indices = @transform_1, window_bounds = array<i64: 8, 1024>}, {transform_indices = @transform_2, window_bounds = array<i64: 8, 1024>}]} {
    %c0 = arith.constant 0 : index
    %0 = memref.load %arg1[%c0] : memref<3xf32, #tpu.memory_space<smem>>
    %c1 = arith.constant 1 : index
    %1 = memref.load %arg1[%c1] : memref<3xf32, #tpu.memory_space<smem>>
    %c2 = arith.constant 2 : index
    %2 = memref.load %arg1[%c2] : memref<3xf32, #tpu.memory_space<smem>>
    %c0_0 = arith.constant 0 : index
    %c0_1 = arith.constant 0 : index
    %3 = vector.load %arg2[%c0_0, %c0_1] : memref<8x1024xf32, #tpu.memory_space<vmem>>, vector<8x1024xf32>
    %cst = arith.constant 0.000000e+00 : f32
    %4 = vector.broadcast %cst : f32 to vector<8x1024xf32>
    %5 = arith.maximumf %4, %3 : vector<8x1024xf32>
    %6 = vector.broadcast %0 : f32 to vector<8x1024xf32>
    %7 = arith.minimumf %6, %5 : vector<8x1024xf32>
    %8 = vector.broadcast %1 : f32 to vector<8x1024xf32>
    %9 = arith.mulf %7, %8 : vector<8x1024xf32>
    %10 = math.floor %9 : vector<8x1024xf32>
    %11 = vector.broadcast %2 : f32 to vector<8x1024xf32>
    %12 = arith.mulf %10, %11 : vector<8x1024xf32>
    %c0_2 = arith.constant 0 : index
    %c0_3 = arith.constant 0 : index
    %13 = vector.load %arg3[%c0_2, %c0_3] : memref<8x1024xf32, #tpu.memory_space<vmem>>, vector<8x1024xf32>
    tpu.vector_store %arg3[%c0_2, %c0_3], %12 {strides = array<i32>} : memref<8x1024xf32, #tpu.memory_space<vmem>>, vector<8x1024xf32>,
    return
  }
  func.func @transform_0(%arg0: i32) -> i32 {
    %c0_i32 = arith.constant 0 : i32
    %c0_i32_0 = arith.constant 0 : i32
    return %c0_i32 : i32
  }
  func.func @transform_1(%arg0: i32) -> (i32, i32) {
    %c0_i32 = arith.constant 0 : i32
    %c0_i32_0 = arith.constant 0 : i32
    return %arg0, %c0_i32 : i32, i32
  }
  func.func @transform_2(%arg0: i32) -> (i32, i32) {
    %c0_i32 = arith.constant 0 : i32
    %c0_i32_0 = arith.constant 0 : i32
    return %arg0, %c0_i32 : i32, i32
  }
}

</mosaic_0001>

<bundles_post_ra>
// kernel: div.2
= control target key start
LH: loop header
LB: loop body
LE: loop exit
PB: predicated region body
PF: predicated region fallthrough
CT: control target
= control target key end

     0   :  { %s37_s0 = inlined_call_operand.vmem [shape: f32[2], index: 0, kind: input, shape index: {}]   ;;  %s38_s1 = inlined_call_operand.vmem [shape: f32[2], index: 1, kind: input, shape index: {}]   ;;  %s39_s2 = inlined_call_operand.vmem [shape: f32[2], index: 2, kind: output, shape index: {}]  }
   0x1   :  { %v4_v0 = vld [vmem:[%s38_s1] sm:$0x1] }
   0x2   :  { %11 = vrcp.f32 %v4_v0  ;;  %v3_v1 = vld [vmem:[%s37_s0] sm:$0x1] }
   0xf   :  { %v12_v2 = vpop.eup %11 }
  0x10   :  { %v8_v3 = vmul.f32 %v12_v2, %v3_v1 }
  0x12   :  { %10 = vst [vmem:[%s39_s2] sm:$0x1] %v8_v3 }

// kernel: quant_pact_activ.1
= control target key start
LH: loop header
LB: loop body
LE: loop exit
PB: predicated region body
PF: predicated region fallthrough
CT: control target
= control target key end

     0   :  { %7 = vsyncpa [#allocation3], 0  ;;  %s175_s0 = inlined_call_operand.vmem [shape: f32[3], index: 0, kind: input, shape index: {}]   ;;  %s176_s1 = inlined_call_operand.vmem [shape: f32[8,1024], index: 1, kind: input, shape index: {}]   ;;  %s177_s2 = inlined_call_operand.vmem [shape: f32[8,1024], index: 2, kind: output, shape index: {}]  }
   0x1   :  { %s14_s11 = sshll.u32 %s175_s0, 4  ;;  %s15_s11 = int_to_ptr.vmem [resolvable:$true] %s14_s11 }
   0x2   :  { %s94_s12 = scalar_lea.vmem %s15_s11, 16  ;;  %p99_p1 = scmp.lt.s32.totalorder %s15_s11, %s15_s11 }
   0x3   :  { %p95_p0 = scmp.ne.s32.totalorder %s15_s11, %s94_s12  ;;  %p100_p2 = scmp.lt.s32.totalorder %s94_s12, %s94_s12 }
   0x5   :  { %p101_p3 = por %p100_p2, %p99_p1 }
   0x7   :  { %p102_p4 = pnand %p101_p3, %p95_p0 }
   0x9   :  { %105 = shalt.err (!%p102_p4)
}
   0xa   :  { %s108_s13 = smov [#allocation2]  }
   0xb   :  { %17 = dma.vmem_to_smem %s15_s11, 16, %s108_s13, [#allocation3]  }
   0xc   :  { %106 = dma.done.wait [#allocation3], 16  }
   0xd   :  { %107 = vsyncadd [#allocation3], 4294967280 }
   0xe   :  { %23 = sfence }
   0xf   :  { %s24_s14 = sld [smem:[#allocation2]]  ;;  %v27_v0 = vld [vmem:[%s176_s1] sm:$0xff]  ;;  %v28_v1 = vld [vmem:[%s176_s1 + $0x8] sm:$0xff]  ;;  %v29_v2 = vld [vmem:[%s176_s1 + $0x10] sm:$0xff] }
  0x10   :  { %s91_s20 = sld [smem:[#allocation2 + $0x1]]  ;;  %v30_v3 = vld [vmem:[%s176_s1 + $0x18] sm:$0xff]  ;;  %v31_v4 = vld [vmem:[%s176_s1 + $0x20] sm:$0xff]  ;;  %v32_v5 = vld [vmem:[%s176_s1 + $0x28] sm:$0xff]  ;;  %v35_v7 = vmax.f32 %v27_v0, 0.0  ;;  %v36_v8 = vmax.f32 %v28_v1, 0.0 }
  0x11   :  { %s92_s23 = sld [smem:[#allocation2 + $0x2]]  ;;  %v33_v6 = vld [vmem:[%s176_s1 + $0x30] sm:$0xff]  ;;  %v37_v9 = vmax.f32 %v29_v2, 0.0  ;;  %v34_v10 = vld [vmem:[%s176_s1 + $0x38] sm:$0xff]  ;;  %v38_v11 = vmax.f32 %v30_v3, 0.0  ;;  %v39_v12 = vmax.f32 %v31_v4, 0.0 }
  0x12   :  { %v40_v13 = vmax.f32 %v32_v5, 0.0  ;;  %v41_v14 = vmax.f32 %v33_v6, 0.0  ;;  %v42_v16 = vmax.f32 %v34_v10, 0.0 }
  0x15   :  { %v43_v15 = vstv %s24_s14 }
  0x16   :  { %v44_v17 = vmin.f32 %v43_v15, %v35_v7  ;;  %v52_v18 = vstv %s91_s20  ;;  %v45_v19 = vmin.f32 %v43_v15, %v36_v8  ;;  %v46_v20 = vmin.f32 %v43_v15, %v37_v9 }
  0x17   :  { %v69_v21 = vstv %s92_s23  ;;  %v47_v22 = vmin.f32 %v43_v15, %v38_v11  ;;  %v48_v23 = vmin.f32 %v43_v15, %v39_v12  ;;  %v49_v24 = vmin.f32 %v43_v15, %v40_v13 }
  0x18   :  { %v53_v25 = vmul.f32 %v52_v18, %v44_v17  ;;  %v54_v26 = vmul.f32 %v52_v18, %v45_v19  ;;  %v55_v27 = vmul.f32 %v52_v18, %v46_v20  ;;  %v50_v28 = vmin.f32 %v43_v15, %v41_v14 }
  0x19   :  { %v56_v29 = vmul.f32 %v52_v18, %v47_v22  ;;  %v57_v30 = vmul.f32 %v52_v18, %v48_v23  ;;  %v58_v31 = vmul.f32 %v52_v18, %v49_v24  ;;  %v51_v32 = vmin.f32 %v43_v15, %v42_v16 }
  0x1a   :  { %v61_v33 = vfloor.f32 %v53_v25  ;;  %v62_v34 = vfloor.f32 %v54_v26  ;;  %v63_v35 = vfloor.f32 %v55_v27  ;;  %v59_v36 = vmul.f32 %v52_v18, %v50_v28 }
  0x1b   :  { %v64_v37 = vfloor.f32 %v56_v29  ;;  %v65_v38 = vfloor.f32 %v57_v30  ;;  %v66_v39 = vfloor.f32 %v58_v31  ;;  %v60_v40 = vmul.f32 %v52_v18, %v51_v32 }
  0x1c   :  { %v70_v41 = vmul.f32 %v69_v21, %v61_v33  ;;  %v71_v42 = vmul.f32 %v69_v21, %v62_v34  ;;  %v72_v43 = vmul.f32 %v69_v21, %v63_v35  ;;  %v67_v44 = vfloor.f32 %v59_v36 }
  0x1d   :  { %v73_v45 = vmul.f32 %v69_v21, %v64_v37  ;;  %v74_v46 = vmul.f32 %v69_v21, %v65_v38  ;;  %v75_v47 = vmul.f32 %v69_v21, %v66_v39  ;;  %v68_v48 = vfloor.f32 %v60_v40 }
  0x1e   :  { %78 = vst [vmem:[%s177_s2] sm:$0xff] %v70_v41  ;;  %79 = vst [vmem:[%s177_s2 + $0x8] sm:$0xff] %v71_v42  ;;  %v76_v49 = vmul.f32 %v69_v21, %v67_v44 }
  0x1f   :  { %80 = vst [vmem:[%s177_s2 + $0x10] sm:$0xff] %v72_v43  ;;  %81 = vst [vmem:[%s177_s2 + $0x18] sm:$0xff] %v73_v45  ;;  %v77_v50 = vmul.f32 %v69_v21, %v68_v48 }
  0x20   :  { %82 = vst [vmem:[%s177_s2 + $0x20] sm:$0xff] %v74_v46  ;;  %83 = vst [vmem:[%s177_s2 + $0x28] sm:$0xff] %v75_v47 }
  0x21   :  { %84 = vst [vmem:[%s177_s2 + $0x30] sm:$0xff] %v76_v49  ;;  %85 = vst [vmem:[%s177_s2 + $0x38] sm:$0xff] %v77_v50 }
  0x22   :  { %90 = vsyncpa [#allocation3], 1 }

</bundles_post_ra>
